<compile_context>
chip_gen: v5e
topology: v5e:2x2
jax: 0.10.0
libtpu: 0.0.40
codegen_flags: <defaults>
</compile_context>

<pallas_src>
import functools

import jax
import jax.numpy as jnp
from jax.experimental import pallas as pl
from jax.experimental.pallas import tpu as pltpu

LANE = 128


def _round_up(x, m):
    return ((x + m - 1) // m) * m


# ----------------------------- Pallas kernel ------------------------------ #

def fused_gcn_kernel(*refs, n_layers, layer_dims_p):
    """Fused multi-layer GCN for one graph (one grid step).

    refs = (a_ref, x_ref, w_0, b_0, ..., w_{L-1}, b_{L-1}, o_ref)
      a_ref : (1, Np, Np)      bf16   normalized adjacency (this graph)
      x_ref : (1, Np, Dp_in)   bf16   node features (this graph)
      w_i   : (Dp_i, Dp_{i+1}) bf16   layer weight (shared across graphs)
      b_i   : (1, Dp_{i+1})    f32    layer bias   (shared across graphs)
      o_ref : (1, Np, Dp_out)  f32    output embeddings

    All last dims are multiples of 128, so every load/store is lane-dense.
    """
    a_ref, x_ref = refs[0], refs[1]
    o_ref = refs[-1]

    a = a_ref[0]          # (Np, Np) bf16
    h = x_ref[0]          # (Np, Dp_in) bf16

    for i in range(n_layers):
        w_ref = refs[2 + 2 * i]
        b_ref = refs[3 + 2 * i]
        din_p, dout_p = layer_dims_p[i]

        if din_p <= dout_p:
            # Expanding layer: aggregate first, then project — the N^2-sized
            # matmul runs at the narrower (padded) feature width.
            t = jnp.dot(a, h, preferred_element_type=jnp.float32)
            y = jnp.dot(t.astype(jnp.bfloat16), w_ref[...],
                        preferred_element_type=jnp.float32)
        else:
            # Shrinking layer: project first, then aggregate.
            t = jnp.dot(h, w_ref[...], preferred_element_type=jnp.float32)
            y = jnp.dot(a, t.astype(jnp.bfloat16),
                        preferred_element_type=jnp.float32)

        y = y + b_ref[...]                      # f32 bias, broadcast over rows

        if i < n_layers - 1:
            h = jnp.maximum(y, 0.0).astype(jnp.bfloat16)   # ReLU, stays in VMEM
        else:
            o_ref[0] = y.astype(o_ref.dtype)


# ------------------------------- Model glue -------------------------------- #

def normalize_adj(adj):
    """DGL GraphConv(norm='both'): A_hat = D^{-1/2} A D^{-1/2} (deg 0 -> 0)."""
    deg = adj.sum(axis=1)
    dinv = jnp.where(deg > 0, jax.lax.rsqrt(jnp.maximum(deg, 1e-12)), 0.0)
    return dinv[:, None] * adj * dinv[None, :]


def _vmem_limit_bytes():
    """Scoped-VMEM limit: ~85% of physical (def. 16/32 MiB is far too small)."""
    try:
        return int(pltpu.get_tpu_info().vmem_capacity_bytes * 0.85)
    except Exception:
        return 100 << 20   # conservative for v5e/v6e (128 MiB physical)


def ecrgs_forward(enc_params, a1, x1, a2, x2, a, x):
    """Batched fused forward over the 3 graphs via a single pallas_call."""
    n_layers = len(enc_params)
    n = a1.shape[0]
    # Pad N to 128 lanes: last dim of A_hat and the MXU contraction dim of the
    # dominant A @ h matmul must be lane-dense.
    n_p = _round_up(n, LANE)

    dims = [enc_params[0][0].shape[0]] + [w.shape[1] for w, _ in enc_params]
    dims_p = [_round_up(d, LANE) for d in dims]
    # Matmul-association rule decided on PADDED widths (what the MXU runs).
    layer_dims_p = tuple((dims_p[i], dims_p[i + 1]) for i in range(n_layers))

    # --- pad + stack adjacency / features (zero padding is exact) --- #
    def pad_a(adj):
        return jnp.pad(normalize_adj(adj), ((0, n_p - n), (0, n_p - n)))

    def pad_x(feat):
        return jnp.pad(feat, ((0, n_p - n), (0, dims_p[0] - dims[0])))

    a_stack = jnp.stack([pad_a(a1), pad_a(a2), pad_a(a)]).astype(jnp.bfloat16)
    x_stack = jnp.stack([pad_x(x1), pad_x(x2), pad_x(x)]).astype(jnp.bfloat16)

    w_pads, b_pads = [], []
    for i, (w, b) in enumerate(enc_params):
        wp = jnp.pad(w, ((0, dims_p[i] - dims[i]),
                         (0, dims_p[i + 1] - dims[i + 1]))).astype(jnp.bfloat16)
        bp = jnp.pad(b, (0, dims_p[i + 1] - dims[i + 1]))
        b_pads.append(bp.astype(jnp.float32).reshape(1, dims_p[i + 1]))
        w_pads.append(wp)

    # --- block specs: graph axis tiled, weights/biases pinned (same block) --- #
    in_specs = [
        pl.BlockSpec((1, n_p, n_p), lambda g: (g, 0, 0)),          # A_hat[g]
        pl.BlockSpec((1, n_p, dims_p[0]), lambda g: (g, 0, 0)),    # X[g]
    ]
    for i in range(n_layers):
        in_specs.append(
            pl.BlockSpec((dims_p[i], dims_p[i + 1]), lambda g: (0, 0)))  # W_i
        in_specs.append(
            pl.BlockSpec((1, dims_p[i + 1]), lambda g: (0, 0)))          # b_i

    out_spec = pl.BlockSpec((1, n_p, dims_p[-1]), lambda g: (g, 0, 0))

    # --- cost estimate (per the chosen association, all 3 graphs) --- #
    flops = 0
    for i, (dinp, doutp) in enumerate(layer_dims_p):
        if dinp <= doutp:
            flops += 2 * n_p * n_p * dinp + 2 * n_p * dinp * doutp
        else:
            flops += 2 * n_p * dinp * doutp + 2 * n_p * n_p * doutp
    flops *= 3
    bytes_accessed = (
        3 * (n_p * n_p * 2 + n_p * dims_p[0] * 2 + n_p * dims_p[-1] * 4)
        + sum(w.size * 2 for w in w_pads) + sum(b.size * 4 for b in b_pads))

    kernel = functools.partial(
        fused_gcn_kernel, n_layers=n_layers, layer_dims_p=layer_dims_p)

    flat_wb = [t for pair in zip(w_pads, b_pads) for t in pair]

    out = pl.pallas_call(
        kernel,
        out_shape=jax.ShapeDtypeStruct((3, n_p, dims_p[-1]), jnp.float32),
        grid=(3,),
        in_specs=in_specs,
        out_specs=out_spec,
        compiler_params=pltpu.CompilerParams(
            dimension_semantics=("parallel",),
            vmem_limit_bytes=_vmem_limit_bytes()),
        cost_estimate=pl.CostEstimate(
            flops=flops, transcendentals=0, bytes_accessed=bytes_accessed),
    )(a_stack, x_stack, *flat_wb)

    d_out = dims[-1]
    return out[0, :n, :d_out], out[1, :n, :d_out], out[2, :n, :d_out]


# ------------------------------- Param init -------------------------------- #

def glorot_uniform(key, shape):
    fan_in, fan_out = shape
    bound = jnp.sqrt(6.0 / (fan_in + fan_out))
    return jax.random.uniform(key, shape, jnp.float32, -bound, bound)


def init_encoder_params(key, in_dim, hid_dim, out_dim, n_layers):
    # Matches GCN.__init__: n_layers == 1 -> single (in_dim -> hid_dim) conv.
    if n_layers > 1:
        dims = [in_dim] + [hid_dim] * (n_layers - 1) + [out_dim]
    else:
        dims = [in_dim, hid_dim]
    keys = jax.random.split(key, len(dims) - 1)
    params = []
    for i in range(len(dims) - 1):
        w = glorot_uniform(keys[i], (dims[i], dims[i + 1]))
        b = jnp.zeros((dims[i + 1],), jnp.float32)
        params.append((w, b))
    return params


# ---------------------------------- Main ----------------------------------- #

if __name__ == "__main__":
    in_dim, hid_dim, out_dim = 8, 32, 16
    n_layers = 2
    num_nodes = 16

    key = jax.random.PRNGKey(0)
    kp, k1, k2, k3, ka1, ka2, ka3 = jax.random.split(key, 7)

    enc_params = init_encoder_params(kp, in_dim, hid_dim, out_dim, n_layers)

    def random_graph(k):
        ku, _ = jax.random.split(k)
        m = (jax.random.uniform(ku, (num_nodes, num_nodes)) < 0.3).astype(jnp.float32)
        m = jnp.maximum(m, m.T)                       # symmetric
        m = m * (1.0 - jnp.eye(num_nodes))            # no self loops
        return m

    feat1 = jax.random.normal(k1, (num_nodes, in_dim), jnp.float32)
    feat2 = jax.random.normal(k2, (num_nodes, in_dim), jnp.float32)
    feat = jax.random.normal(k3, (num_nodes, in_dim), jnp.float32)
    adj1 = random_graph(ka1)
    adj2 = random_graph(ka2)
    adj = random_graph(ka3)

    fwd = jax.jit(ecrgs_forward)
    z1, z2, z = fwd(enc_params, adj1, feat1, adj2, feat2, adj, feat)
    jax.block_until_ready((z1, z2, z))

    assert z1.shape == (num_nodes, out_dim)
    assert z2.shape == (num_nodes, out_dim)
    assert z.shape == (num_nodes, out_dim)
    assert bool(jnp.all(jnp.isfinite(z1)) & jnp.all(jnp.isfinite(z2))
                & jnp.all(jnp.isfinite(z)))
    print("KERNEL_OK")
</pallas_src>

<mosaic_0001>
module attributes {stable_mosaic.version = 11 : i64} {
  func.func @fused_gcn_kernel(%arg0: i32, %arg1: memref<1x128x128xbf16, #tpu.memory_space<vmem>>, %arg2: memref<1x128x128xbf16, #tpu.memory_space<vmem>>, %arg3: memref<128x128xbf16, #tpu.memory_space<vmem>>, %arg4: memref<1x128xf32, #tpu.memory_space<vmem>>, %arg5: memref<128x128xbf16, #tpu.memory_space<vmem>>, %arg6: memref<1x128xf32, #tpu.memory_space<vmem>>, %arg7: memref<1x128x128xf32, #tpu.memory_space<vmem>>) attributes {dimension_semantics = [#tpu.dimension_semantics<parallel>], iteration_bounds = array<i64: 3>, scalar_prefetch = 0 : i64, scratch_operands = 0 : i64, tpu.core_type = #tpu.core_type<tc>, window_params = [{transform_indices = @transform_0, window_bounds = array<i64: 1, 128, 128>}, {transform_indices = @transform_1, window_bounds = array<i64: 1, 128, 128>}, {pipeline_mode = #tpu.pipeline_mode<synchronous>, transform_indices = @transform_2, window_bounds = array<i64: 128, 128>}, {pipeline_mode = #tpu.pipeline_mode<synchronous>, transform_indices = @transform_3, window_bounds = array<i64: 1, 128>}, {pipeline_mode = #tpu.pipeline_mode<synchronous>, transform_indices = @transform_4, window_bounds = array<i64: 128, 128>}, {pipeline_mode = #tpu.pipeline_mode<synchronous>, transform_indices = @transform_5, window_bounds = array<i64: 1, 128>}, {transform_indices = @transform_6, window_bounds = array<i64: 1, 128, 128>}]} {
    %c0 = arith.constant 0 : index
    %c0_0 = arith.constant 0 : index
    %c0_1 = arith.constant 0 : index
    %0 = vector.load %arg1[%c0, %c0_0, %c0_1] : memref<1x128x128xbf16, #tpu.memory_space<vmem>>, vector<1x128x128xbf16>
    %1 = vector.shape_cast %0 : vector<1x128x128xbf16> to vector<128x128xbf16>
    %c0_2 = arith.constant 0 : index
    %c0_3 = arith.constant 0 : index
    %c0_4 = arith.constant 0 : index
    %2 = vector.load %arg2[%c0_2, %c0_3, %c0_4] : memref<1x128x128xbf16, #tpu.memory_space<vmem>>, vector<1x128x128xbf16>
    %3 = vector.shape_cast %2 : vector<1x128x128xbf16> to vector<128x128xbf16>
    %cst = arith.constant dense<0.000000e+00> : vector<128x128xf32>
    %4 = tpu.matmul %1, %3, %cst {dimension_numbers = #tpu.dot_dimension_numbers<[1], [0], [0], [1], [0, 0, 1, 1], [], []>} : vector<128x128xbf16>, vector<128x128xbf16>, vector<128x128xf32> -> vector<128x128xf32>
    %5 = arith.truncf %4 : vector<128x128xf32> to vector<128x128xbf16>
    %c0_5 = arith.constant 0 : index
    %c0_6 = arith.constant 0 : index
    %6 = vector.load %arg3[%c0_5, %c0_6] : memref<128x128xbf16, #tpu.memory_space<vmem>>, vector<128x128xbf16>
    %cst_7 = arith.constant dense<0.000000e+00> : vector<128x128xf32>
    %7 = tpu.matmul %5, %6, %cst_7 {dimension_numbers = #tpu.dot_dimension_numbers<[1], [0], [0], [1], [0, 0, 1, 1], [], []>} : vector<128x128xbf16>, vector<128x128xbf16>, vector<128x128xf32> -> vector<128x128xf32>
    %c0_8 = arith.constant 0 : index
    %c0_9 = arith.constant 0 : index
    %8 = vector.load %arg4[%c0_8, %c0_9] : memref<1x128xf32, #tpu.memory_space<vmem>>, vector<1x128xf32>
    %9 = vector.broadcast %8 : vector<1x128xf32> to vector<128x128xf32>
    %10 = arith.addf %7, %9 : vector<128x128xf32>
    %cst_10 = arith.constant 0.000000e+00 : f32
    %11 = vector.broadcast %cst_10 : f32 to vector<128x128xf32>
    %12 = arith.maximumf %10, %11 : vector<128x128xf32>
    %13 = arith.truncf %12 : vector<128x128xf32> to vector<128x128xbf16>
    %cst_11 = arith.constant dense<0.000000e+00> : vector<128x128xf32>
    %14 = tpu.matmul %1, %13, %cst_11 {dimension_numbers = #tpu.dot_dimension_numbers<[1], [0], [0], [1], [0, 0, 1, 1], [], []>} : vector<128x128xbf16>, vector<128x128xbf16>, vector<128x128xf32> -> vector<128x128xf32>
    %15 = arith.truncf %14 : vector<128x128xf32> to vector<128x128xbf16>
    %c0_12 = arith.constant 0 : index
    %c0_13 = arith.constant 0 : index
    %16 = vector.load %arg5[%c0_12, %c0_13] : memref<128x128xbf16, #tpu.memory_space<vmem>>, vector<128x128xbf16>
    %cst_14 = arith.constant dense<0.000000e+00> : vector<128x128xf32>
    %17 = tpu.matmul %15, %16, %cst_14 {dimension_numbers = #tpu.dot_dimension_numbers<[1], [0], [0], [1], [0, 0, 1, 1], [], []>} : vector<128x128xbf16>, vector<128x128xbf16>, vector<128x128xf32> -> vector<128x128xf32>
    %c0_15 = arith.constant 0 : index
    %c0_16 = arith.constant 0 : index
    %18 = vector.load %arg6[%c0_15, %c0_16] : memref<1x128xf32, #tpu.memory_space<vmem>>, vector<1x128xf32>
    %19 = vector.broadcast %18 : vector<1x128xf32> to vector<128x128xf32>
    %20 = arith.addf %17, %19 : vector<128x128xf32>
    %c0_17 = arith.constant 0 : index
    %c0_18 = arith.constant 0 : index
    %c0_19 = arith.constant 0 : index
    %21 = vector.load %arg7[%c0_17, %c0_18, %c0_19] : memref<1x128x128xf32, #tpu.memory_space<vmem>>, vector<1x128x128xf32>
    %22 = vector.shape_cast %21 : vector<1x128x128xf32> to vector<128x128xf32>
    %23 = vector.shape_cast %20 : vector<128x128xf32> to vector<1x128x128xf32>
    tpu.vector_store %arg7[%c0_17, %c0_18, %c0_19], %23 {strides = array<i32>} : memref<1x128x128xf32, #tpu.memory_space<vmem>>, vector<1x128x128xf32>,
    return
  }
  func.func @transform_0(%arg0: i32) -> (i32, i32, i32) {
    %c0_i32 = arith.constant 0 : i32
    %c0_i32_0 = arith.constant 0 : i32
    %c0_i32_1 = arith.constant 0 : i32
    return %arg0, %c0_i32, %c0_i32_0 : i32, i32, i32
  }
  func.func @transform_1(%arg0: i32) -> (i32, i32, i32) {
    %c0_i32 = arith.constant 0 : i32
    %c0_i32_0 = arith.constant 0 : i32
    %c0_i32_1 = arith.constant 0 : i32
    return %arg0, %c0_i32, %c0_i32_0 : i32, i32, i32
  }
  func.func @transform_2(%arg0: i32) -> (i32, i32) {
    %c0_i32 = arith.constant 0 : i32
    %c0_i32_0 = arith.constant 0 : i32
    %c0_i32_1 = arith.constant 0 : i32
    return %c0_i32, %c0_i32_0 : i32, i32
  }
  func.func @transform_3(%arg0: i32) -> (i32, i32) {
    %c0_i32 = arith.constant 0 : i32
    %c0_i32_0 = arith.constant 0 : i32
    %c0_i32_1 = arith.constant 0 : i32
    return %c0_i32, %c0_i32_0 : i32, i32
  }
  func.func @transform_4(%arg0: i32) -> (i32, i32) {
    %c0_i32 = arith.constant 0 : i32
    %c0_i32_0 = arith.constant 0 : i32
    %c0_i32_1 = arith.constant 0 : i32
    return %c0_i32, %c0_i32_0 : i32, i32
  }
  func.func @transform_5(%arg0: i32) -> (i32, i32) {
    %c0_i32 = arith.constant 0 : i32
    %c0_i32_0 = arith.constant 0 : i32
    %c0_i32_1 = arith.constant 0 : i32
    return %c0_i32, %c0_i32_0 : i32, i32
  }
  func.func @transform_6(%arg0: i32) -> (i32, i32, i32) {
    %c0_i32 = arith.constant 0 : i32
    %c0_i32_0 = arith.constant 0 : i32
    %c0_i32_1 = arith.constant 0 : i32
    return %arg0, %c0_i32, %c0_i32_0 : i32, i32, i32
  }
}

</mosaic_0001>

<bundles_post_ra>
// kernel: ecrgs_forward.1
= control target key start
LH: loop header
LB: loop body
LE: loop exit
PB: predicated region body
PF: predicated region fallthrough
CT: control target
= control target key end

     0   :  { %s1084_s21 = smov 0   ;;  %s1222_s0 = inlined_call_operand.vmem [shape: bf16[3,128,128], index: 0, kind: input, shape index: {}]   ;;  %s1223_s1 = inlined_call_operand.vmem [shape: bf16[3,128,128], index: 1, kind: input, shape index: {}]   ;;  %s1224_s2 = inlined_call_operand.vmem [shape: bf16[128,128], index: 2, kind: input, shape index: {}]   ;;  %s1225_s3 = inlined_call_operand.vmem [shape: f32[1,128], index: 3, kind: input, shape index: {}]   ;;  %s1226_s4 = inlined_call_operand.vmem [shape: bf16[128,128], index: 4, kind: input, shape index: {}]   ;;  %s1227_s5 = inlined_call_operand.vmem [shape: f32[1,128], index: 5, kind: input, shape index: {}]   ;;  %s1228_s6 = inlined_call_operand.vmem [shape: f32[3,128,128], index: 6, kind: output, shape index: {}]  }
   0x1 LB: > { %s855_s22 = sadd.s32 4294967295, %s1047_s21   ;;  %p859_p0 = scmp.ge.s32.totalorder %s1047_s21, 1  ;;  %s1047_s21 = sphi %s1084_s21, %s16_s21  }
   0x2   : > { %p222_p1 = scmp.lt.s32.totalorder %s1047_s21, 4 }
   0x4   : > { %p223_p2 = pnand %p859_p0, %p222_p1 }
   0x5   : > { %p257_p3 = scmp.lt.s32.totalorder (!%p223_p2), %s855_s22, 2 }
   0x6   : > { %226 = sbr.rel (%p223_p2) target bundleno = 862 (0x35e), region = 44 }
   0xb   : > { %s1230_s22 = smov (!%p257_p3, %s855_s22), 2  ;;  %v1022_v13 = vld [vmem:[%s1224_s2 + $0x38] sm:$0xff]  ;;  %v1021_v14 = vld [vmem:[%s1224_s2 + $0x30] sm:$0xff]  ;;  %v1020_v16 = vld [vmem:[%s1224_s2 + $0x28] sm:$0xff] }
   0xc   : > { %s996_s23 = sshll.u32 %s1230_s22, 6  ;;  %525 = vmatpush.bf16.msra.mxu1 %v1022_v13  ;;  %v1019_v17 = vld [vmem:[%s1224_s2 + $0x20] sm:$0xff]  ;;  %v1018_v18 = vld [vmem:[%s1224_s2 + $0x18] sm:$0xff]  ;;  %v1017_v19 = vld [vmem:[%s1224_s2 + $0x10] sm:$0xff]  ;;  %s998_s18 = sshll.u32 %s1230_s22, 7 }
   0xd   : > { %s266_s26 = scalar_lea.vmem %s1223_s1, %s996_s23  ;;  %s1101_s29 = scalar_lea.vmem %s1222_s0, %s996_s23  ;;  %v1016_v21 = vld [vmem:[%s1224_s2 + $0x8] sm:$0xff]  ;;  %v1015_v22 = vld [vmem:[%s1224_s2] sm:$0xff] }
   0xe   : > { %v1014_v0 = vld [vmem:[%s266_s26 + $0x38] sm:$0xff]  ;;  %v1013_v1 = vld [vmem:[%s266_s26 + $0x30] sm:$0xff]  ;;  %v1012_v2 = vld [vmem:[%s266_s26 + $0x28] sm:$0xff]  ;;  %s1201_s25 = scalar_lea.vmem %s1228_s6, %s998_s18 }
   0xf   : > { %400 = vmatpush.bf16.msra.mxu0 %v1014_v0  ;;  %v1011_v3 = vld [vmem:[%s266_s26 + $0x20] sm:$0xff]  ;;  %v1010_v4 = vld [vmem:[%s266_s26 + $0x18] sm:$0xff]  ;;  %v1009_v5 = vld [vmem:[%s266_s26 + $0x10] sm:$0xff] }
  0x10   : > { %v1008_v6 = vld [vmem:[%s266_s26 + $0x8] sm:$0xff]  ;;  %v1007_v7 = vld [vmem:[%s266_s26] sm:$0xff]  ;;  %v1112_v10 = vld [vmem:[%s1101_s29 + $0x10] sm:$0xff]  ;;  %526 = vmatpush.bf16.msra.mxu1 %v1021_v14 }
  0x11   : > { %v1104_v8 = vld [vmem:[%s1101_s29] sm:$0xff]  ;;  %v1108_v9 = vld [vmem:[%s1101_s29 + $0x8] sm:$0xff]  ;;  %v1116_v11 = vld [vmem:[%s1101_s29 + $0x18] sm:$0xff] }
  0x12   : > { %v1120_v12 = vld [vmem:[%s1101_s29 + $0x20] sm:$0xff]  ;;  %v1130_v15 = vld [vmem:[%s1101_s29 + $0x28] sm:$0xff]  ;;  %v1146_v20 = vld [vmem:[%s1101_s29 + $0x30] sm:$0xff] }
  0x13   : > { %401 = vmatpush.bf16.msra.mxu0 %v1013_v1  ;;  %v1156_v23 = vld [vmem:[%s1101_s29 + $0x38] sm:$0xff]  ;;  %v1039_v49 = vld [vmem:[%s1225_s3] ss:$0 sm:$0xff] }
  0x14   : > { %527 = vmatpush.bf16.msra.mxu1 %v1020_v16 }
  0x17   : > { %402 = vmatpush.bf16.msra.mxu0 %v1012_v2 }
  0x18   : > { %528 = vmatpush.bf16.msra.mxu1 %v1019_v17 }
  0x1b   : > { %403 = vmatpush.bf16.msra.mxu0 %v1011_v3 }
  0x1c   : > { %529 = vmatpush.bf16.msra.mxu1 %v1018_v18 }
  0x1f   : > { %404 = vmatpush.bf16.msra.mxu0 %v1010_v4 }
  0x20   : > { %530 = vmatpush.bf16.msra.mxu1 %v1017_v19 }
  0x23   : > { %405 = vmatpush.bf16.msra.mxu0 %v1009_v5 }
  0x24   : > { %531 = vmatpush.bf16.msra.mxu1 %v1016_v21 }
  0x27   : > { %406 = vmatpush.bf16.msra.mxu0 %v1008_v6 }
  0x28   : > { %532 = vmatpush.bf16.msra.mxu1 %v1015_v22 }
  0x2b   : > { %407 = vmatpush.bf16.msra.mxu0 %v1007_v7 }
  0x2e   : > { %408 = vmatmul.bf16.vlgmr.msra.gmra.mxu0 %v1104_v8 }
  0x3e   : > { %413 = vmatmul.bf16.gmra.mxu0 %v1108_v9 }
  0x4e   : > { %418 = vmatmul.bf16.gmra.mxu0 %v1112_v10 }
  0x5e   : > { %423 = vmatmul.bf16.gmra.mxu0 %v1116_v11 }
  0x6e   : > { %428 = vmatmul.bf16.gmra.mxu0 %v1120_v12 }
  0x7e   : > { %433 = vmatmul.bf16.gmra.mxu0 %v1130_v15 }
  0x8e   : > { %438 = vmatmul.bf16.gmra.mxu0 %v1146_v20 }
  0x9e   : > { %443 = vmatmul.bf16.gmra.mxu0 %v1156_v23 }
  0xab   : > { %v409_v24 = vpop.f32.mrf.mxu0 }
  0xb3   : > { %v411_v25 = vpop.f32.mrf.mxu0 }
  0xb4   : > { %v449_v26 = vpack.c.bf16 %v411_v25, %v409_v24 }
  0xb6   : > { %533 = vmatmul.bf16.vlgmr.msra.gmra.mxu1 %v449_v26 }
  0xbb   : > { %v414_v27 = vpop.f32.mrf.mxu0 }
  0xc3   : > { %v416_v28 = vpop.f32.mrf.mxu0 }
  0xc4   : > { %v450_v29 = vpack.c.bf16 %v416_v28, %v414_v27 }
  0xc6   : > { %538 = vmatmul.bf16.gmra.mxu1 %v450_v29 }
  0xcb   : > { %v419_v30 = vpop.f32.mrf.mxu0 }
  0xd3   : > { %v421_v31 = vpop.f32.mrf.mxu0 }
  0xd4   : > { %v451_v32 = vpack.c.bf16 %v421_v31, %v419_v30 }
  0xd6   : > { %543 = vmatmul.bf16.gmra.mxu1 %v451_v32 }
  0xdb   : > { %v424_v33 = vpop.f32.mrf.mxu0 }
  0xe3   : > { %v426_v34 = vpop.f32.mrf.mxu0 }
  0xe4   : > { %v452_v35 = vpack.c.bf16 %v426_v34, %v424_v33 }
  0xe6   : > { %548 = vmatmul.bf16.gmra.mxu1 %v452_v35 }
  0xeb   : > { %v429_v36 = vpop.f32.mrf.mxu0 }
  0xf3   : > { %v431_v37 = vpop.f32.mrf.mxu0 }
  0xf4   : > { %v453_v38 = vpack.c.bf16 %v431_v37, %v429_v36 }
  0xf6   : > { %553 = vmatmul.bf16.gmra.mxu1 %v453_v38 }
  0xfb   : > { %v434_v39 = vpop.f32.mrf.mxu0 }
 0x103   : > { %v436_v40 = vpop.f32.mrf.mxu0 }
 0x104   : > { %v454_v41 = vpack.c.bf16 %v436_v40, %v434_v39 }
 0x106   : > { %558 = vmatmul.bf16.gmra.mxu1 %v454_v41 }
 0x10b   : > { %v439_v42 = vpop.f32.mrf.mxu0 }
 0x113   : > { %v441_v43 = vpop.f32.mrf.mxu0 }
 0x114   : > { %v455_v44 = vpack.c.bf16 %v441_v43, %v439_v42 }
 0x116   : > { %563 = vmatmul.bf16.gmra.mxu1 %v455_v44 }
 0x11b   : > { %v444_v45 = vpop.f32.mrf.mxu0 }
 0x123   : > { %v446_v46 = vpop.f32.mrf.mxu0 }
 0x124   : > { %v456_v47 = vpack.c.bf16 %v446_v46, %v444_v45 }
 0x126   : > { %568 = vmatmul.bf16.gmra.mxu1 %v456_v47 }
 0x133   : > { %v534_v48 = vpop.f32.mrf.mxu1 }
 0x134   : > { %v535_v50 = vadd.f32 %v1039_v49, %v534_v48 }
 0x136   : > { %v574_v53 = vmax.f32 %v535_v50, 0.0  ;;  %v1029_v50 = vld [vmem:[%s1226_s4 + $0x30] sm:$0xff] }
 0x13b   : > { %v536_v51 = vpop.f32.mrf.mxu1 }
 0x13c   : > { %v537_v52 = vadd.f32 %v1039_v49, %v536_v51 }
 0x13e   : > { %v575_v54 = vmax.f32 %v537_v52, 0.0 }
 0x140   : > { %v590_v55 = vpack.c.bf16 %v575_v54, %v574_v53 }
 0x143   : > { %v539_v56 = vpop.f32.mrf.mxu1 }
 0x144   : > { %v540_v57 = vadd.f32 %v1039_v49, %v539_v56 }
 0x146   : > { %v576_v60 = vmax.f32 %v540_v57, 0.0 }
 0x14b   : > { %v541_v58 = vpop.f32.mrf.mxu1 }
 0x14c   : > { %v542_v59 = vadd.f32 %v1039_v49, %v541_v58 }
 0x14e   : > { %v577_v61 = vmax.f32 %v542_v59, 0.0 }
 0x150   : > { %v591_v62 = vpack.c.bf16 %v577_v61, %v576_v60 }
 0x153   : > { %v544_v63 = vpop.f32.mrf.mxu1 }
 0x154   : > { %v545_v0 = vadd.f32 %v1039_v49, %v544_v63 }
 0x156   : > { %v578_v3 = vmax.f32 %v545_v0, 0.0 }
 0x15b   : > { %v546_v1 = vpop.f32.mrf.mxu1 }
 0x15c   : > { %v547_v2 = vadd.f32 %v1039_v49, %v546_v1 }
 0x15e   : > { %v579_v4 = vmax.f32 %v547_v2, 0.0 }
 0x160   : > { %v592_v5 = vpack.c.bf16 %v579_v4, %v578_v3 }
 0x163   : > { %v549_v6 = vpop.f32.mrf.mxu1 }
 0x164   : > { %v550_v7 = vadd.f32 %v1039_v49, %v549_v6 }
 0x166   : > { %v580_v16 = vmax.f32 %v550_v7, 0.0 }
 0x16b   : > { %v551_v13 = vpop.f32.mrf.mxu1 }
 0x16c   : > { %v552_v14 = vadd.f32 %v1039_v49, %v551_v13 }
 0x16e   : > { %v581_v17 = vmax.f32 %v552_v14, 0.0  ;;  %v1040_v14 = vld [vmem:[%s1227_s5] ss:$0 sm:$0xff] }
 0x170   : > { %v593_v18 = vpack.c.bf16 %v581_v17, %v580_v16 }
 0x173   : > { %v554_v19 = vpop.f32.mrf.mxu1 }
 0x174   : > { %v555_v43 = vadd.f32 %v1039_v49, %v554_v19 }
 0x176   : > { %v582_v47 = vmax.f32 %v555_v43, 0.0 }
 0x17b   : > { %v556_v21 = vpop.f32.mrf.mxu1 }
 0x17c   : > { %v557_v40 = vadd.f32 %v1039_v49, %v556_v21 }
 0x17e   : > { %v583_v45 = vmax.f32 %v557_v40, 0.0 }
 0x180   : > { %v594_v48 = vpack.c.bf16 %v583_v45, %v582_v47 }
 0x183   : > { %v559_v22 = vpop.f32.mrf.mxu1 }
 0x184   : > { %v560_v38 = vadd.f32 %v1039_v49, %v559_v22 }
 0x186   : > { %v584_v44 = vmax.f32 %v560_v38, 0.0 }
 0x18b   : > { %v561_v24 = vpop.f32.mrf.mxu1 }
 0x18c   : > { %v562_v35 = vadd.f32 %v1039_v49, %v561_v24 }
 0x18e   : > { %v585_v41 = vmax.f32 %v562_v35, 0.0 }
 0x190   : > { %v595_v46 = vpack.c.bf16 %v585_v41, %v584_v44 }
 0x193   : > { %v564_v25 = vpop.f32.mrf.mxu1 }
 0x194   : > { %v565_v32 = vadd.f32 %v1039_v49, %v564_v25 }
 0x196   : > { %v586_v39 = vmax.f32 %v565_v32, 0.0 }
 0x19b   : > { %v566_v26 = vpop.f32.mrf.mxu1 }
 0x19c   : > { %v567_v30 = vadd.f32 %v1039_v49, %v566_v26 }
 0x19e   : > { %v587_v36 = vmax.f32 %v567_v30, 0.0 }
 0x1a0   : > { %v596_v42 = vpack.c.bf16 %v587_v36, %v586_v39 }
 0x1a3   : > { %v569_v27 = vpop.f32.mrf.mxu1 }
 0x1a4   : > { %v570_v28 = vadd.f32 %v1039_v49, %v569_v27 }
 0x1a6   : > { %v588_v33 = vmax.f32 %v570_v28, 0.0 }
 0x1ab   : > { %v571_v29 = vpop.f32.mrf.mxu1 }
 0x1ac   : > { %v572_v31 = vadd.f32 %v1039_v49, %v571_v29  ;;  %v1030_v49 = vld [vmem:[%s1226_s4 + $0x38] sm:$0xff] }
 0x1ad   : > { %723 = vmatpush.bf16.msra.mxu3 %v1030_v49 }
 0x1ae   : > { %v589_v34 = vmax.f32 %v572_v31, 0.0 }
 0x1b0   : > { %v597_v37 = vpack.c.bf16 %v589_v34, %v588_v33 }
 0x1b1   : > { %724 = vmatpush.bf16.msra.mxu3 %v1029_v50 }
 0x1b2   : > { %598 = vmatpush.bf16.msra.mxu2 %v597_v37 }
 0x1b6   : > { %599 = vmatpush.bf16.msra.mxu2 %v596_v42 }
 0x1ba   : > { %600 = vmatpush.bf16.msra.mxu2 %v595_v46 }
 0x1be   : > { %601 = vmatpush.bf16.msra.mxu2 %v594_v48 }
 0x1c2   : > { %602 = vmatpush.bf16.msra.mxu2 %v593_v18 }
 0x1c6   : > { %603 = vmatpush.bf16.msra.mxu2 %v592_v5 }
 0x1ca   : > { %604 = vmatpush.bf16.msra.mxu2 %v591_v62 }
 0x1ce   : > { %605 = vmatpush.bf16.msra.mxu2 %v590_v55 }
 0x1d1   : > { %606 = vmatmul.bf16.vlgmr.msra.gmra.mxu2 %v1104_v8  ;;  %v1028_v8 = vld [vmem:[%s1226_s4 + $0x28] sm:$0xff] }
 0x1d2   : > { %725 = vmatpush.bf16.msra.mxu3 %v1028_v8 }
 0x1e1   : > { %611 = vmatmul.bf16.gmra.mxu2 %v1108_v9  ;;  %v1027_v9 = vld [vmem:[%s1226_s4 + $0x20] sm:$0xff] }
 0x1e2   : > { %726 = vmatpush.bf16.msra.mxu3 %v1027_v9 }
 0x1f1   : > { %616 = vmatmul.bf16.gmra.mxu2 %v1112_v10  ;;  %v1026_v10 = vld [vmem:[%s1226_s4 + $0x18] sm:$0xff] }
 0x1f2   : > { %727 = vmatpush.bf16.msra.mxu3 %v1026_v10 }
 0x201   : > { %621 = vmatmul.bf16.gmra.mxu2 %v1116_v11  ;;  %v1025_v11 = vld [vmem:[%s1226_s4 + $0x10] sm:$0xff] }
 0x202   : > { %728 = vmatpush.bf16.msra.mxu3 %v1025_v11 }
 0x211   : > { %626 = vmatmul.bf16.gmra.mxu2 %v1120_v12  ;;  %v1024_v12 = vld [vmem:[%s1226_s4 + $0x8] sm:$0xff] }
 0x212   : > { %729 = vmatpush.bf16.msra.mxu3 %v1024_v12 }
 0x221   : > { %631 = vmatmul.bf16.gmra.mxu2 %v1130_v15  ;;  %v1023_v15 = vld [vmem:[%s1226_s4] sm:$0xff] }
 0x222   : > { %730 = vmatpush.bf16.msra.mxu3 %v1023_v15 }
 0x231   : > { %636 = vmatmul.bf16.gmra.mxu2 %v1146_v20 }
 0x241   : > { %641 = vmatmul.bf16.gmra.mxu2 %v1156_v23 }
 0x254   : > { %v607_v51 = vpop.f32.mrf.mxu2 }
 0x25c   : > { %v609_v52 = vpop.f32.mrf.mxu2 }
 0x25d   : > { %v647_v20 = vpack.c.bf16 %v609_v52, %v607_v51 }
 0x25f   : > { %731 = vmatmul.bf16.vlgmr.msra.gmra.mxu3 %v647_v20 }
 0x264   : > { %v612_v53 = vpop.f32.mrf.mxu2 }
 0x26c   : > { %v614_v54 = vpop.f32.mrf.mxu2 }
 0x26d   : > { %v648_v55 = vpack.c.bf16 %v614_v54, %v612_v53 }
 0x26f   : > { %736 = vmatmul.bf16.gmra.mxu3 %v648_v55 }
 0x274   : > { %v617_v56 = vpop.f32.mrf.mxu2 }
 0x27c   : > { %v619_v57 = vpop.f32.mrf.mxu2 }
 0x27d   : > { %v649_v58 = vpack.c.bf16 %v619_v57, %v617_v56 }
 0x27f   : > { %741 = vmatmul.bf16.gmra.mxu3 %v649_v58 }
 0x284   : > { %v622_v59 = vpop.f32.mrf.mxu2 }
 0x28c   : > { %v624_v60 = vpop.f32.mrf.mxu2 }
 0x28d   : > { %v650_v61 = vpack.c.bf16 %v624_v60, %v622_v59 }
 0x28f   : > { %746 = vmatmul.bf16.gmra.mxu3 %v650_v61 }
 0x294   : > { %v627_v62 = vpop.f32.mrf.mxu2 }
 0x29c   : > { %v629_v63 = vpop.f32.mrf.mxu2 }
 0x29d   : > { %v651_v23 = vpack.c.bf16 %v629_v63, %v627_v62 }
 0x29f   : > { %751 = vmatmul.bf16.gmra.mxu3 %v651_v23 }
 0x2a4   : > { %v632_v0 = vpop.f32.mrf.mxu2 }
 0x2ac   : > { %v634_v1 = vpop.f32.mrf.mxu2 }
 0x2ad   : > { %v652_v2 = vpack.c.bf16 %v634_v1, %v632_v0 }
 0x2af   : > { %756 = vmatmul.bf16.gmra.mxu3 %v652_v2 }
 0x2b4   : > { %v637_v3 = vpop.f32.mrf.mxu2 }
 0x2bc   : > { %v639_v4 = vpop.f32.mrf.mxu2 }
 0x2bd   : > { %v653_v5 = vpack.c.bf16 %v639_v4, %v637_v3 }
 0x2bf   : > { %761 = vmatmul.bf16.gmra.mxu3 %v653_v5 }
 0x2c4   : > { %v642_v6 = vpop.f32.mrf.mxu2 }
 0x2cc   : > { %v644_v7 = vpop.f32.mrf.mxu2 }
 0x2cd   : > { %v654_v13 = vpack.c.bf16 %v644_v7, %v642_v6 }
 0x2cf   : > { %766 = vmatmul.bf16.gmra.mxu3 %v654_v13 }
 0x2e2   : > { %v732_v16 = vpop.f32.mrf.mxu3 }
 0x2e3   : > { %v733_v17 = vadd.f32 %v1040_v14, %v732_v16 }
 0x2e5   : > { %772 = vst [vmem:[%s1201_s25] sm:$0xff] %v733_v17 }
 0x2ea   : > { %v734_v18 = vpop.f32.mrf.mxu3 }
 0x2eb   : > { %v735_v19 = vadd.f32 %v1040_v14, %v734_v18 }
 0x2ed   : > { %773 = vst [vmem:[%s1201_s25 + $0x8] sm:$0xff] %v735_v19 }
 0x2f2   : > { %v737_v21 = vpop.f32.mrf.mxu3 }
 0x2f3   : > { %v738_v22 = vadd.f32 %v1040_v14, %v737_v21 }
 0x2f5   : > { %774 = vst [vmem:[%s1201_s25 + $0x10] sm:$0xff] %v738_v22 }
 0x2fa   : > { %v739_v24 = vpop.f32.mrf.mxu3 }
 0x2fb   : > { %v740_v25 = vadd.f32 %v1040_v14, %v739_v24 }
 0x2fd   : > { %775 = vst [vmem:[%s1201_s25 + $0x18] sm:$0xff] %v740_v25 }
 0x302   : > { %v742_v26 = vpop.f32.mrf.mxu3 }
 0x303   : > { %v743_v27 = vadd.f32 %v1040_v14, %v742_v26 }
 0x305   : > { %776 = vst [vmem:[%s1201_s25 + $0x20] sm:$0xff] %v743_v27 }
 0x30a   : > { %v744_v28 = vpop.f32.mrf.mxu3 }
 0x30b   : > { %v745_v29 = vadd.f32 %v1040_v14, %v744_v28 }
 0x30d   : > { %777 = vst [vmem:[%s1201_s25 + $0x28] sm:$0xff] %v745_v29 }
 0x312   : > { %v747_v30 = vpop.f32.mrf.mxu3 }
 0x313   : > { %v748_v31 = vadd.f32 %v1040_v14, %v747_v30 }
 0x315   : > { %778 = vst [vmem:[%s1201_s25 + $0x30] sm:$0xff] %v748_v31 }
 0x31a   : > { %v749_v32 = vpop.f32.mrf.mxu3 }
 0x31b   : > { %v750_v33 = vadd.f32 %v1040_v14, %v749_v32 }
 0x31d   : > { %779 = vst [vmem:[%s1201_s25 + $0x38] sm:$0xff] %v750_v33 }
 0x322   : > { %v752_v34 = vpop.f32.mrf.mxu3 }
 0x323   : > { %v753_v35 = vadd.f32 %v1040_v14, %v752_v34 }
 0x325   : > { %780 = vst [vmem:[%s1201_s25 + $0x40] sm:$0xff] %v753_v35 }
 0x32a   : > { %v754_v36 = vpop.f32.mrf.mxu3 }
 0x32b   : > { %v755_v37 = vadd.f32 %v1040_v14, %v754_v36 }
 0x32d   : > { %781 = vst [vmem:[%s1201_s25 + $0x48] sm:$0xff] %v755_v37 }
 0x332   : > { %v757_v38 = vpop.f32.mrf.mxu3 }
 0x333   : > { %v758_v39 = vadd.f32 %v1040_v14, %v757_v38 }
 0x335   : > { %782 = vst [vmem:[%s1201_s25 + $0x50] sm:$0xff] %v758_v39 }
 0x33a   : > { %v759_v40 = vpop.f32.mrf.mxu3 }
 0x33b   : > { %v760_v41 = vadd.f32 %v1040_v14, %v759_v40 }
 0x33d   : > { %783 = vst [vmem:[%s1201_s25 + $0x58] sm:$0xff] %v760_v41 }
 0x342   : > { %v762_v42 = vpop.f32.mrf.mxu3 }
 0x343   : > { %v763_v43 = vadd.f32 %v1040_v14, %v762_v42 }
 0x345   : > { %784 = vst [vmem:[%s1201_s25 + $0x60] sm:$0xff] %v763_v43 }
 0x34a   : > { %v764_v44 = vpop.f32.mrf.mxu3 }
 0x34b   : > { %v765_v45 = vadd.f32 %v1040_v14, %v764_v44 }
 0x34d   : > { %785 = vst [vmem:[%s1201_s25 + $0x68] sm:$0xff] %v765_v45 }
 0x352   : > { %v767_v46 = vpop.f32.mrf.mxu3 }
 0x353   : > { %v768_v47 = vadd.f32 %v1040_v14, %v767_v46 }
 0x355   : > { %786 = vst [vmem:[%s1201_s25 + $0x70] sm:$0xff] %v768_v47 }
 0x35a   : > { %v769_v48 = vpop.f32.mrf.mxu3 }
 0x35b   : > { %v770_v49 = vadd.f32 %v1040_v14, %v769_v48 }
 0x35d   : > { %787 = vst [vmem:[%s1201_s25 + $0x78] sm:$0xff] %v770_v49 }
 0x35e PF: > { %s16_s21 = sadd.s32 1, %s1047_s21  }
 0x35f   : > { %p13_p4 = scmp.ge.s32.totalorder %s16_s21, 5  }
 0x361   :  { %15 = sbr.rel (!%p13_p4) target bundleno = 1 (0x1), region = 77 }

</bundles_post_ra>
